<compile_context>
chip_gen: v7x
topology: tpu7x:2x2x1
jax: 0.10.0
libtpu: 0.0.40
codegen_flags: <defaults>
</compile_context>

<pallas_src>
import functools

import jax
import jax.numpy as jnp
from jax.experimental import pallas as pl
from jax.experimental.pallas import tpu as pltpu

LANE = 128     # TPU lane width -> pad feature dims to a multiple of this
SUBLANE = 8    # f32 sublane   -> pad node counts to a multiple of this


def _round_up(x, m):
    return (x + m - 1) // m * m


def _pad2d(x, rows, cols, dtype=None):
    """Zero-pad a 2-D array to (rows, cols), optionally casting."""
    dt = x.dtype if dtype is None else dtype
    out = jnp.zeros((rows, cols), dt)
    return out.at[: x.shape[0], : x.shape[1]].set(x.astype(dt))


def fused_gcn3_kernel(
    a0_ref, ns0_ref, nd0_ref,
    a1_ref, ns1_ref, nd1_ref,
    a2_ref, ns2_ref, nd2_ref,
    x0_ref,
    w1_ref, b1_ref, w2_ref, b2_ref, w3_ref, b3_ref,
    o_ref,
    h1_ref, h2_ref,
    *, proj_first,
):
    """Three fused GraphConv('both') + ReLU layers, fully resident in VMEM.

    a*_ref : (n_dst, n_src) bf16  dense block adjacency
    ns*_ref: (n_src, 1)     f32   D_src^{-1/2}   (precomputed, degree-clamped)
    nd*_ref: (n_dst, 1)     f32   D_dst^{-1/2}   (precomputed, degree-clamped)
    x0_ref : (n_src0, f_in) f32   input node features (padded)
    w*/b*  : f32 padded weights / (1, f_out) biases
    o_ref  : (n_dst2, f_out) f32  final layer output
    h1/h2  : VMEM scratch for the intermediate activations (never touch HBM)
    """

    def layer(a_ref, ns_ref, nd_ref, x, w_ref, b_ref, pf):
        a = a_ref[...]                                   # bf16 (n_dst, n_src)
        ns = ns_ref[...]                                 # f32  (n_src, 1)
        nd = nd_ref[...]                                 # f32  (n_dst, 1)
        w = w_ref[...]                                   # f32  (f_in, f_out)
        b = b_ref[...]                                   # f32  (1, f_out)

        # Source-side symmetric normalization applied to the features (not to A).
        xs = x * ns                                      # f32 (n_src, f_in)

        if pf:
            # project first (cheaper when it shrinks the A-matmul)
            xw = jnp.dot(xs, w, preferred_element_type=jnp.float32)
            agg = jnp.dot(a, xw.astype(jnp.bfloat16),
                          preferred_element_type=jnp.float32)
        else:
            # aggregate first (cheaper when n_dst << n_src with equal feat widths)
            agg = jnp.dot(a, xs.astype(jnp.bfloat16),
                          preferred_element_type=jnp.float32)
            agg = jnp.dot(agg, w, preferred_element_type=jnp.float32)

        out = nd * agg + b                               # dst-side norm + bias (f32)
        return jnp.maximum(out, 0.0)                     # ReLU

    h1_ref[...] = layer(a0_ref, ns0_ref, nd0_ref, x0_ref[...], w1_ref, b1_ref,
                        proj_first[0])
    h2_ref[...] = layer(a1_ref, ns1_ref, nd1_ref, h1_ref[...], w2_ref, b2_ref,
                        proj_first[1])
    o_ref[...] = layer(a2_ref, ns2_ref, nd2_ref, h2_ref[...], w3_ref, b3_ref,
                       proj_first[2])


def stochastic_two_layer_gcn_forward(blocks, x0, params):
    """Mirrors StochasticTwoLayerGCN.forward: 3 GraphConv+ReLU layers, one kernel.

    blocks : 3 dense 0/1 adjacencies (n_dst_i, n_src_i), n_src_{i+1} == n_dst_i
    x0     : (n_src_0, in_features) f32
    params : [(W1, b1), (W2, b2), (W3, b3)]
    """
    (w1, b1), (w2, b2), (w3, b3) = params
    a0, a1, a2 = blocks

    in_f, hid_f = w1.shape
    out_f = w3.shape[1]
    n1, n0 = a0.shape
    n2, _ = a1.shape
    n3, _ = a2.shape

    # Padded sizes: node counts -> sublane multiples, feature dims -> 128 lanes.
    n0p, n1p, n2p, n3p = (_round_up(n, SUBLANE) for n in (n0, n1, n2, n3))
    fip, fhp, fop = (_round_up(f, LANE) for f in (in_f, hid_f, out_f))

    def prep_block(a, nd_p, ns_p):
        # Zero-pad A; compute symmetric-norm vectors from the full adjacency
        # (padding adds only zero rows/cols, so real-node degrees are unchanged).
        ap = _pad2d(a.astype(jnp.float32), nd_p, ns_p)
        deg_src = jnp.maximum(jnp.sum(ap, axis=0, keepdims=True), 1.0)  # (1, ns_p)
        deg_dst = jnp.maximum(jnp.sum(ap, axis=1, keepdims=True), 1.0)  # (nd_p, 1)
        norm_src = jax.lax.rsqrt(deg_src).T                             # (ns_p, 1)
        norm_dst = jax.lax.rsqrt(deg_dst)                               # (nd_p, 1)
        return ap.astype(jnp.bfloat16), norm_src, norm_dst

    a0p, ns0, nd0 = prep_block(a0, n1p, n0p)
    a1p, ns1, nd1 = prep_block(a1, n2p, n1p)
    a2p, ns2, nd2 = prep_block(a2, n3p, n2p)

    x0p = _pad2d(x0.astype(jnp.float32), n0p, fip)
    w1p = _pad2d(w1, fip, fhp)
    w2p = _pad2d(w2, fhp, fhp)
    w3p = _pad2d(w3, fhp, fop)
    b1p = _pad2d(b1.reshape(1, -1), 1, fhp)
    b2p = _pad2d(b2.reshape(1, -1), 1, fhp)
    b3p = _pad2d(b3.reshape(1, -1), 1, fop)

    # Static per-layer matmul order choice (same criterion DGL uses).
    def choose_proj_first(n_dst, n_src, f_in, f_out):
        agg_first = n_dst * n_src * f_in + n_dst * f_in * f_out
        prj_first = n_src * f_in * f_out + n_dst * n_src * f_out
        return prj_first < agg_first

    pf = (
        choose_proj_first(n1p, n0p, fip, fhp),
        choose_proj_first(n2p, n1p, fhp, fhp),
        choose_proj_first(n3p, n2p, fhp, fop),
    )

    def layer_flops(n_dst, n_src, f_in, f_out, p):
        if p:
            return 2 * (n_src * f_in * f_out + n_dst * n_src * f_out)
        return 2 * (n_dst * n_src * f_in + n_dst * f_in * f_out)

    flops = (layer_flops(n1p, n0p, fip, fhp, pf[0])
             + layer_flops(n2p, n1p, fhp, fhp, pf[1])
             + layer_flops(n3p, n2p, fhp, fop, pf[2]))
    inputs = (a0p, ns0, nd0, a1p, ns1, nd1, a2p, ns2, nd2,
              x0p, w1p, b1p, w2p, b2p, w3p, b3p)
    bytes_accessed = sum(int(t.size) * t.dtype.itemsize for t in inputs)
    bytes_accessed += n3p * fop * 4

    vmem = pl.BlockSpec(memory_space=pltpu.MemorySpace.VMEM)
    kernel = functools.partial(fused_gcn3_kernel, proj_first=pf)

    out_p = pl.pallas_call(
        kernel,
        out_shape=jax.ShapeDtypeStruct((n3p, fop), jnp.float32),
        in_specs=[vmem] * len(inputs),
        out_specs=vmem,
        scratch_shapes=[
            pltpu.VMEM((n1p, fhp), jnp.float32),   # x1 (never leaves VMEM)
            pltpu.VMEM((n2p, fhp), jnp.float32),   # x2 (never leaves VMEM)
        ],
        compiler_params=pltpu.CompilerParams(
            vmem_limit_bytes=32 * 1024 * 1024,     # safe on v5e/v6e/v7x
        ),
        cost_estimate=pl.CostEstimate(
            flops=flops, transcendentals=0, bytes_accessed=bytes_accessed),
    )(*inputs)

    # Slice away feature/node padding (x_dst slicing in the PyTorch forward is
    # bookkeeping only; output already has n_dst rows).
    return out_p[:n3, :out_f]


def gcn_reference(blocks, x0, params):
    """Pure-JAX f32 reference with identical GraphConv('both') semantics."""
    x = x0
    for a, (w, b) in zip(blocks, params):
        deg_src = jnp.maximum(jnp.sum(a, axis=0, keepdims=True), 1.0)
        deg_dst = jnp.maximum(jnp.sum(a, axis=1, keepdims=True), 1.0)
        h = x * jax.lax.rsqrt(deg_src).T
        h = (a @ h) @ w
        h = h * jax.lax.rsqrt(deg_dst) + b
        x = jnp.maximum(h, 0.0)
    return x


def make_params(key, in_features, hidden_features, out_features):
    """Deterministic xavier-uniform-like weights, zero biases (DGL GraphConv default)."""
    def xavier(k, fan_in, fan_out):
        limit = (6.0 / (fan_in + fan_out)) ** 0.5
        return jax.random.uniform(k, (fan_in, fan_out), jnp.float32, -limit, limit)

    k1, k2, k3 = jax.random.split(key, 3)
    return [
        (xavier(k1, in_features, hidden_features),
         jnp.zeros((1, hidden_features), jnp.float32)),
        (xavier(k2, hidden_features, hidden_features),
         jnp.zeros((1, hidden_features), jnp.float32)),
        (xavier(k3, hidden_features, out_features),
         jnp.zeros((1, out_features), jnp.float32)),
    ]


if __name__ == "__main__":
    key = jax.random.PRNGKey(0)
    k_feat, k_param, ka0, ka1, ka2 = jax.random.split(key, 5)

    in_features, hidden_features, out_features = 16, 32, 8
    n0, n1, n2, n3 = 64, 32, 16, 8   # src/dst node counts of the 3 sampled blocks

    # Input node features for block 0's source nodes.
    x0 = jax.random.normal(k_feat, (n0, in_features), jnp.float32)

    # Dense 0/1 bipartite block adjacencies (n_dst, n_src).
    a0 = (jax.random.uniform(ka0, (n1, n0)) < 0.2).astype(jnp.float32)
    a1 = (jax.random.uniform(ka1, (n2, n1)) < 0.3).astype(jnp.float32)
    a2 = (jax.random.uniform(ka2, (n3, n2)) < 0.4).astype(jnp.float32)

    params = make_params(k_param, in_features, hidden_features, out_features)

    fwd = jax.jit(stochastic_two_layer_gcn_forward)
    out = jax.block_until_ready(fwd((a0, a1, a2), x0, params))

    assert out.shape == (n3, out_features)
    assert out.dtype == jnp.float32
    assert bool(jnp.all(out >= 0.0))  # ReLU output

    ref = gcn_reference((a0, a1, a2), x0, params)
    max_err = float(jnp.max(jnp.abs(out - ref)))
    assert max_err < 7.5e-2, f"max abs err vs f32 reference: {max_err}"

    print("KERNEL_OK")
</pallas_src>

<mosaic_0001>
module attributes {stable_mosaic.version = 11 : i64} {
  func.func @fused_gcn3_kernel(%arg0: memref<32x64xbf16, #tpu.memory_space<vmem>>, %arg1: memref<64x1xf32, #tpu.memory_space<vmem>>, %arg2: memref<32x1xf32, #tpu.memory_space<vmem>>, %arg3: memref<16x32xbf16, #tpu.memory_space<vmem>>, %arg4: memref<32x1xf32, #tpu.memory_space<vmem>>, %arg5: memref<16x1xf32, #tpu.memory_space<vmem>>, %arg6: memref<8x16xbf16, #tpu.memory_space<vmem>>, %arg7: memref<16x1xf32, #tpu.memory_space<vmem>>, %arg8: memref<8x1xf32, #tpu.memory_space<vmem>>, %arg9: memref<64x128xf32, #tpu.memory_space<vmem>>, %arg10: memref<128x128xf32, #tpu.memory_space<vmem>>, %arg11: memref<1x128xf32, #tpu.memory_space<vmem>>, %arg12: memref<128x128xf32, #tpu.memory_space<vmem>>, %arg13: memref<1x128xf32, #tpu.memory_space<vmem>>, %arg14: memref<128x128xf32, #tpu.memory_space<vmem>>, %arg15: memref<1x128xf32, #tpu.memory_space<vmem>>, %arg16: memref<8x128xf32, #tpu.memory_space<vmem>>, %arg17: memref<32x128xf32, #tpu.memory_space<vmem>>, %arg18: memref<16x128xf32, #tpu.memory_space<vmem>>) attributes {dimension_semantics = [], scalar_prefetch = 0 : i64, scratch_operands = 2 : i64, tpu.core_type = #tpu.core_type<tc>} {
    %c0 = arith.constant 0 : index
    %c0_0 = arith.constant 0 : index
    %0 = vector.load %arg9[%c0, %c0_0] : memref<64x128xf32, #tpu.memory_space<vmem>>, vector<64x128xf32>
    %c0_1 = arith.constant 0 : index
    %c0_2 = arith.constant 0 : index
    %1 = vector.load %arg0[%c0_1, %c0_2] : memref<32x64xbf16, #tpu.memory_space<vmem>>, vector<32x64xbf16>
    %c0_3 = arith.constant 0 : index
    %c0_4 = arith.constant 0 : index
    %2 = vector.load %arg1[%c0_3, %c0_4] : memref<64x1xf32, #tpu.memory_space<vmem>>, vector<64x1xf32>
    %c0_5 = arith.constant 0 : index
    %c0_6 = arith.constant 0 : index
    %3 = vector.load %arg2[%c0_5, %c0_6] : memref<32x1xf32, #tpu.memory_space<vmem>>, vector<32x1xf32>
    %c0_7 = arith.constant 0 : index
    %c0_8 = arith.constant 0 : index
    %4 = vector.load %arg10[%c0_7, %c0_8] : memref<128x128xf32, #tpu.memory_space<vmem>>, vector<128x128xf32>
    %c0_9 = arith.constant 0 : index
    %c0_10 = arith.constant 0 : index
    %5 = vector.load %arg11[%c0_9, %c0_10] : memref<1x128xf32, #tpu.memory_space<vmem>>, vector<1x128xf32>
    %6 = vector.broadcast %2 : vector<64x1xf32> to vector<64x128xf32>
    %7 = arith.mulf %0, %6 : vector<64x128xf32>
    %8 = arith.truncf %7 : vector<64x128xf32> to vector<64x128xbf16>
    %cst = arith.constant dense<0.000000e+00> : vector<32x128xf32>
    %9 = tpu.matmul %1, %8, %cst {dimension_numbers = #tpu.dot_dimension_numbers<[1], [0], [0], [1], [0, 0, 1, 1], [], []>} : vector<32x64xbf16>, vector<64x128xbf16>, vector<32x128xf32> -> vector<32x128xf32>
    %cst_11 = arith.constant dense<0.000000e+00> : vector<32x128xf32>
    %10 = tpu.matmul %9, %4, %cst_11 {dimension_numbers = #tpu.dot_dimension_numbers<[1], [0], [0], [1], [0, 0, 1, 1], [], []>} : vector<32x128xf32>, vector<128x128xf32>, vector<32x128xf32> -> vector<32x128xf32>
    %11 = vector.broadcast %3 : vector<32x1xf32> to vector<32x128xf32>
    %12 = arith.mulf %11, %10 : vector<32x128xf32>
    %13 = vector.broadcast %5 : vector<1x128xf32> to vector<32x128xf32>
    %14 = arith.addf %12, %13 : vector<32x128xf32>
    %cst_12 = arith.constant 0.000000e+00 : f32
    %15 = vector.broadcast %cst_12 : f32 to vector<32x128xf32>
    %16 = arith.maximumf %14, %15 : vector<32x128xf32>
    %c0_13 = arith.constant 0 : index
    %c0_14 = arith.constant 0 : index
    %17 = vector.load %arg17[%c0_13, %c0_14] : memref<32x128xf32, #tpu.memory_space<vmem>>, vector<32x128xf32>
    tpu.vector_store %arg17[%c0_13, %c0_14], %16 {strides = array<i32>} : memref<32x128xf32, #tpu.memory_space<vmem>>, vector<32x128xf32>,
    %c0_15 = arith.constant 0 : index
    %c0_16 = arith.constant 0 : index
    %18 = vector.load %arg17[%c0_15, %c0_16] : memref<32x128xf32, #tpu.memory_space<vmem>>, vector<32x128xf32>
    %c0_17 = arith.constant 0 : index
    %c0_18 = arith.constant 0 : index
    %19 = vector.load %arg3[%c0_17, %c0_18] : memref<16x32xbf16, #tpu.memory_space<vmem>>, vector<16x32xbf16>
    %c0_19 = arith.constant 0 : index
    %c0_20 = arith.constant 0 : index
    %20 = vector.load %arg4[%c0_19, %c0_20] : memref<32x1xf32, #tpu.memory_space<vmem>>, vector<32x1xf32>
    %c0_21 = arith.constant 0 : index
    %c0_22 = arith.constant 0 : index
    %21 = vector.load %arg5[%c0_21, %c0_22] : memref<16x1xf32, #tpu.memory_space<vmem>>, vector<16x1xf32>
    %c0_23 = arith.constant 0 : index
    %c0_24 = arith.constant 0 : index
    %22 = vector.load %arg12[%c0_23, %c0_24] : memref<128x128xf32, #tpu.memory_space<vmem>>, vector<128x128xf32>
    %c0_25 = arith.constant 0 : index
    %c0_26 = arith.constant 0 : index
    %23 = vector.load %arg13[%c0_25, %c0_26] : memref<1x128xf32, #tpu.memory_space<vmem>>, vector<1x128xf32>
    %24 = vector.broadcast %20 : vector<32x1xf32> to vector<32x128xf32>
    %25 = arith.mulf %18, %24 : vector<32x128xf32>
    %26 = arith.truncf %25 : vector<32x128xf32> to vector<32x128xbf16>
    %cst_27 = arith.constant dense<0.000000e+00> : vector<16x128xf32>
    %27 = tpu.matmul %19, %26, %cst_27 {dimension_numbers = #tpu.dot_dimension_numbers<[1], [0], [0], [1], [0, 0, 1, 1], [], []>} : vector<16x32xbf16>, vector<32x128xbf16>, vector<16x128xf32> -> vector<16x128xf32>
    %cst_28 = arith.constant dense<0.000000e+00> : vector<16x128xf32>
    %28 = tpu.matmul %27, %22, %cst_28 {dimension_numbers = #tpu.dot_dimension_numbers<[1], [0], [0], [1], [0, 0, 1, 1], [], []>} : vector<16x128xf32>, vector<128x128xf32>, vector<16x128xf32> -> vector<16x128xf32>
    %29 = vector.broadcast %21 : vector<16x1xf32> to vector<16x128xf32>
    %30 = arith.mulf %29, %28 : vector<16x128xf32>
    %31 = vector.broadcast %23 : vector<1x128xf32> to vector<16x128xf32>
    %32 = arith.addf %30, %31 : vector<16x128xf32>
    %cst_29 = arith.constant 0.000000e+00 : f32
    %33 = vector.broadcast %cst_29 : f32 to vector<16x128xf32>
    %34 = arith.maximumf %32, %33 : vector<16x128xf32>
    %c0_30 = arith.constant 0 : index
    %c0_31 = arith.constant 0 : index
    %35 = vector.load %arg18[%c0_30, %c0_31] : memref<16x128xf32, #tpu.memory_space<vmem>>, vector<16x128xf32>
    tpu.vector_store %arg18[%c0_30, %c0_31], %34 {strides = array<i32>} : memref<16x128xf32, #tpu.memory_space<vmem>>, vector<16x128xf32>,
    %c0_32 = arith.constant 0 : index
    %c0_33 = arith.constant 0 : index
    %36 = vector.load %arg18[%c0_32, %c0_33] : memref<16x128xf32, #tpu.memory_space<vmem>>, vector<16x128xf32>
    %c0_34 = arith.constant 0 : index
    %c0_35 = arith.constant 0 : index
    %37 = vector.load %arg6[%c0_34, %c0_35] : memref<8x16xbf16, #tpu.memory_space<vmem>>, vector<8x16xbf16>
    %c0_36 = arith.constant 0 : index
    %c0_37 = arith.constant 0 : index
    %38 = vector.load %arg7[%c0_36, %c0_37] : memref<16x1xf32, #tpu.memory_space<vmem>>, vector<16x1xf32>
    %c0_38 = arith.constant 0 : index
    %c0_39 = arith.constant 0 : index
    %39 = vector.load %arg8[%c0_38, %c0_39] : memref<8x1xf32, #tpu.memory_space<vmem>>, vector<8x1xf32>
    %c0_40 = arith.constant 0 : index
    %c0_41 = arith.constant 0 : index
    %40 = vector.load %arg14[%c0_40, %c0_41] : memref<128x128xf32, #tpu.memory_space<vmem>>, vector<128x128xf32>
    %c0_42 = arith.constant 0 : index
    %c0_43 = arith.constant 0 : index
    %41 = vector.load %arg15[%c0_42, %c0_43] : memref<1x128xf32, #tpu.memory_space<vmem>>, vector<1x128xf32>
    %42 = vector.broadcast %38 : vector<16x1xf32> to vector<16x128xf32>
    %43 = arith.mulf %36, %42 : vector<16x128xf32>
    %44 = arith.truncf %43 : vector<16x128xf32> to vector<16x128xbf16>
    %cst_44 = arith.constant dense<0.000000e+00> : vector<8x128xf32>
    %45 = tpu.matmul %37, %44, %cst_44 {dimension_numbers = #tpu.dot_dimension_numbers<[1], [0], [0], [1], [0, 0, 1, 1], [], []>} : vector<8x16xbf16>, vector<16x128xbf16>, vector<8x128xf32> -> vector<8x128xf32>
    %cst_45 = arith.constant dense<0.000000e+00> : vector<8x128xf32>
    %46 = tpu.matmul %45, %40, %cst_45 {dimension_numbers = #tpu.dot_dimension_numbers<[1], [0], [0], [1], [0, 0, 1, 1], [], []>} : vector<8x128xf32>, vector<128x128xf32>, vector<8x128xf32> -> vector<8x128xf32>
    %47 = vector.broadcast %39 : vector<8x1xf32> to vector<8x128xf32>
    %48 = arith.mulf %47, %46 : vector<8x128xf32>
    %49 = vector.broadcast %41 : vector<1x128xf32> to vector<8x128xf32>
    %50 = arith.addf %48, %49 : vector<8x128xf32>
    %cst_46 = arith.constant 0.000000e+00 : f32
    %51 = vector.broadcast %cst_46 : f32 to vector<8x128xf32>
    %52 = arith.maximumf %50, %51 : vector<8x128xf32>
    %c0_47 = arith.constant 0 : index
    %c0_48 = arith.constant 0 : index
    %53 = vector.load %arg16[%c0_47, %c0_48] : memref<8x128xf32, #tpu.memory_space<vmem>>, vector<8x128xf32>
    tpu.vector_store %arg16[%c0_47, %c0_48], %52 {strides = array<i32>} : memref<8x128xf32, #tpu.memory_space<vmem>>, vector<8x128xf32>,
    return
  }
}

</mosaic_0001>

<bundles_post_ra>
// kernel: stochastic_two_layer_gcn_forward.1
= control target key start
LH: loop header
LB: loop body
LE: loop exit
PB: predicated region body
PF: predicated region fallthrough
CT: control target
= control target key end

     0   :  { %s1421_s0 = inlined_call_operand.vmem [shape: bf16[32,64], index: 0, kind: input, shape index: {}]   ;;  %s1422_s1 = inlined_call_operand.vmem [shape: f32[64,1], index: 1, kind: input, shape index: {}]   ;;  %s1423_s2 = inlined_call_operand.vmem [shape: f32[32,1], index: 2, kind: input, shape index: {}]   ;;  %s1424_s3 = inlined_call_operand.vmem [shape: bf16[16,32], index: 3, kind: input, shape index: {}]   ;;  %s1425_s4 = inlined_call_operand.vmem [shape: f32[32,1], index: 4, kind: input, shape index: {}]   ;;  %s1426_s5 = inlined_call_operand.vmem [shape: f32[16,1], index: 5, kind: input, shape index: {}]   ;;  %s1427_s6 = inlined_call_operand.vmem [shape: bf16[8,16], index: 6, kind: input, shape index: {}]   ;;  %s1428_s7 = inlined_call_operand.vmem [shape: f32[16,1], index: 7, kind: input, shape index: {}]   ;;  %s1429_s8 = inlined_call_operand.vmem [shape: f32[8,1], index: 8, kind: input, shape index: {}]   ;;  %s1430_s9 = inlined_call_operand.vmem [shape: f32[64,128], index: 9, kind: input, shape index: {}]   ;;  %s1431_s10 = inlined_call_operand.vmem [shape: f32[128,128], index: 10, kind: input, shape index: {}]   ;;  %s1432_s11 = inlined_call_operand.vmem [shape: f32[1,128], index: 11, kind: input, shape index: {}]   ;;  %s1433_s12 = inlined_call_operand.vmem [shape: f32[128,128], index: 12, kind: input, shape index: {}]   ;;  %s1434_s13 = inlined_call_operand.vmem [shape: f32[1,128], index: 13, kind: input, shape index: {}]   ;;  %s1435_s14 = inlined_call_operand.vmem [shape: f32[128,128], index: 14, kind: input, shape index: {}]   ;;  %s1436_s15 = inlined_call_operand.vmem [shape: f32[1,128], index: 15, kind: input, shape index: {}]   ;;  %s1437_s16 = inlined_call_operand.hbm [shape: f32[8,128], index: 16, kind: output, shape index: {}]  }
   0x1   :  { %1439 = sst [smem:[#allocation7_spill]] %s1421_s0 }
   0x2   :  { %v69_v0 = vld [vmem:[%s1422_s1 + $0x10] sm:$0xff]  ;;  %v67_v1 = vld [vmem:[%s1422_s1] sm:$0xff]  ;;  %v1056_v2 = vmov 0   ;;  %v70_v3 = vld [vmem:[%s1422_s1 + $0x18] sm:$0xff] }
   0x3   :  { %1028 = vset.pattern.permute.xlu1 %v1056_v2  ;;  %1027 = vset.pattern.permute.xlu0 %v1056_v2  ;;  %v68_v4 = vld [vmem:[%s1422_s1 + $0x8] sm:$0xff]  ;;  %v71_v6 = vld [vmem:[%s1422_s1 + $0x20] sm:$0xff]  ;;  %v74_v7 = vld [vmem:[%s1422_s1 + $0x38] sm:$0xff] }
   0x4   :  { %108 = vperm.xlu1 %1028, %v69_v0   ;;  %98 = vperm.xlu0 %1027, %v67_v1   ;;  %v72_v5 = vld [vmem:[%s1422_s1 + $0x28] sm:$0xff]  ;;  %v73_v8 = vld [vmem:[%s1422_s1 + $0x30] sm:$0xff] }
   0x8   :  { %113 = vperm.xlu1 %1028, %v70_v3   ;;  %103 = vperm.xlu0 %1027, %v68_v4  }
   0xc   :  { %123 = vperm.xlu1 %1028, %v72_v5   ;;  %118 = vperm.xlu0 %1027, %v71_v6  }
   0xd   :  { %21 = vsyncpa [#allocation5], 0  ;;  %v76_v9 = vld [vmem:[%s1423_s2 + $0x8] sm:$0xff]  ;;  %v75_v10 = vld [vmem:[%s1423_s2] sm:$0xff]  ;;  %s1440_s20 = sld [smem:[#allocation7_spill]]  ;;  %vm158_vm0 = vcmask 523264  }
   0xe   :  { %v78_v11 = vld [vmem:[%s1423_s2 + $0x18] sm:$0xff]  ;;  %v77_v12 = vld [vmem:[%s1423_s2 + $0x10] sm:$0xff]  ;;  %v348_v13 = vld [vmem:[%s1425_s4 + $0x8] sm:$0xff]  ;;  %vm1058_vm1 = vmmov 0   ;;  %vm401_vm2 = vcmask 261120   ;;  %vm581_vm3 = vcmask 130048  }
   0xf   :  { %v347_v14 = vld [vmem:[%s1425_s4] sm:$0xff]  ;;  %v350_v16 = vld [vmem:[%s1425_s4 + $0x18] sm:$0xff]  ;;  %v349_v17 = vld [vmem:[%s1425_s4 + $0x10] sm:$0xff]  ;;  %s1060_s21 = smov [#allocation4]  }
  0x10   :  { %133 = vperm.xlu1 %1028, %v74_v7   ;;  %128 = vperm.xlu0 %1027, %v73_v8   ;;  %v352_v18 = vld [vmem:[%s1426_s5 + $0x8] sm:$0xff]  ;;  %v351_v19 = vld [vmem:[%s1426_s5] sm:$0xff]  ;;  %v81_v25 = vld [vmem:[%s1431_s10 + $0x10] sm:$0xff] }
  0x11   :  { %v549_v20 = vld [vmem:[%s1428_s7 + $0x8] sm:$0xff]  ;;  %v548_v21 = vld [vmem:[%s1428_s7] sm:$0xff]  ;;  %v82_v27 = vld [vmem:[%s1431_s10 + $0x18] sm:$0xff]  ;;  %s716_s7 = sshll.u32 %s1060_s21, 4  ;;  %s717_s7 = int_to_ptr.vmem [resolvable:$true] %s716_s7 }
  0x12   :  { %v550_v22 = vld [vmem:[%s1429_s8] sm:$0xff]  ;;  %v80_v24 = vld [vmem:[%s1431_s10 + $0x8] sm:$0xff]  ;;  %v938_v28 = vpack.c.bf16 %v82_v27, %v81_v25  ;;  %v85_v32 = vld [vmem:[%s1431_s10 + $0x30] sm:$0xff]  ;;  %p1037_p1 = scmp.lt.s32.totalorder %s717_s7, %s717_s7 }
  0x13   :  { %v1029_v15 = vld [vmem:[%s1440_s20] sm:$0xff]   ;;  %v84_v30 = vld [vmem:[%s1431_s10 + $0x28] sm:$0xff]  ;;  %v86_v33 = vld [vmem:[%s1431_s10 + $0x38] sm:$0xff] }
  0x14   :  { %306 = vperm.xlu1 %1028, %v76_v9   ;;  %301 = vperm.xlu0 %1027, %v75_v10   ;;  %v79_v23 = vld [vmem:[%s1431_s10] sm:$0xff]  ;;  %v946_v34 = vpack.c.bf16 %v86_v33, %v85_v32  ;;  %v88_v36 = vld [vmem:[%s1431_s10 + $0x48] sm:$0xff]  ;;  %v89_v38 = vld [vmem:[%s1431_s10 + $0x50] sm:$0xff] }
  0x15   :  { %808 = vmatprep.mubr.msk.bf16.mxu0 %vm158_vm0, %v1029_v15  ;;  %v934_v26 = vpack.c.bf16 %v80_v24, %v79_v23  ;;  %v83_v29 = vld [vmem:[%s1431_s10 + $0x20] sm:$0xff]  ;;  %v90_v39 = vld [vmem:[%s1431_s10 + $0x58] sm:$0xff]  ;;  %v92_v42 = vld [vmem:[%s1431_s10 + $0x68] sm:$0xff] }
  0x16   :  { %v942_v31 = vpack.c.bf16 %v84_v30, %v83_v29  ;;  %v87_v35 = vld [vmem:[%s1431_s10 + $0x40] sm:$0xff]  ;;  %v954_v40 = vpack.c.bf16 %v90_v39, %v89_v38  ;;  %v57_v46 = vld [vmem:[%s1430_s9 + $0x10] sm:$0xff]  ;;  %v58_v48 = vld [vmem:[%s1430_s9 + $0x18] sm:$0xff] }
  0x17   :  { %935 = vmatprep.subr.bf16.mxu1 %v934_v26  ;;  %v950_v37 = vpack.c.bf16 %v88_v36, %v87_v35  ;;  %v91_v41 = vld [vmem:[%s1431_s10 + $0x60] sm:$0xff]  ;;  %v56_v49 = vld [vmem:[%s1430_s9 + $0x8] sm:$0xff]  ;;  %v62_v0 = vld [vmem:[%s1430_s9 + $0x38] sm:$0xff] }
  0x18   :  { %316 = vperm.xlu1 %1028, %v78_v11   ;;  %311 = vperm.xlu0 %1027, %v77_v12   ;;  %v958_v43 = vpack.c.bf16 %v92_v42, %v91_v41  ;;  %v55_v47 = vld [vmem:[%s1430_s9] sm:$0xff]  ;;  %v60_v56 = vld [vmem:[%s1430_s9 + $0x28] sm:$0xff]  ;;  %v61_v1 = vld [vmem:[%s1430_s9 + $0x30] sm:$0xff] }
  0x19   :  { %937 = vmatpush3.bf16.msra.mxu1 %v934_v26  ;;  %v59_v57 = vld [vmem:[%s1430_s9 + $0x20] sm:$0xff]  ;;  %v1030_v8 = vld [vmem:[%s1440_s20 + $0x8] sm:$0xff]   ;;  %v93_v9 = vld [vmem:[%s1431_s10 + $0x70] sm:$0xff] }
  0x1a   :  { %939 = vmatprep.subr.bf16.mxu1 %v938_v28  ;;  %v94_v10 = vld [vmem:[%s1431_s10 + $0x78] sm:$0xff] }
  0x1b   :  { %v962_v11 = vpack.c.bf16 %v94_v10, %v93_v9 }
  0x1c   :  { %377 = vperm.xlu1 %1028, %v348_v13   ;;  %372 = vperm.xlu0 %1027, %v347_v14  }
  0x1d   :  { %941 = vmatpush3.bf16.msra.mxu1 %v938_v28 }
  0x1e   :  { %943 = vmatprep.subr.bf16.mxu1 %v942_v31 }
  0x20   :  { %387 = vperm.xlu1 %1028, %v350_v16   ;;  %382 = vperm.xlu0 %1027, %v349_v17   ;;  %v1057_v16 = vmov 0.0  }
  0x21   :  { %945 = vmatpush3.bf16.msra.mxu1 %v942_v31 }
  0x22   :  { %947 = vmatprep.subr.bf16.mxu1 %v946_v34 }
  0x24   :  { %528 = vperm.xlu1 %1028, %v352_v18   ;;  %523 = vperm.xlu0 %1027, %v351_v19  }
  0x25   :  { %949 = vmatpush3.bf16.msra.mxu1 %v946_v34 }
  0x26   :  { %951 = vmatprep.subr.bf16.mxu1 %v950_v37 }
  0x28   :  { %575 = vperm.xlu1 %1028, %v549_v20   ;;  %570 = vperm.xlu0 %1027, %v548_v21   ;;  %v728_v21 = vld [vmem:[%s1432_s11] ss:$0 sm:$0xff] }
  0x29   :  { %953 = vmatpush3.bf16.msra.mxu1 %v950_v37 }
  0x2a   :  { %955 = vmatprep.subr.bf16.mxu1 %v954_v40 }
  0x2c   :  { %697 = vperm.xlu0 %1027, %v550_v22  }
  0x2d   :  { %957 = vmatpush3.bf16.msra.mxu1 %v954_v40 }
  0x2e   :  { %959 = vmatprep.subr.bf16.mxu1 %v958_v43 }
  0x31   :  { %961 = vmatpush3.bf16.msra.mxu1 %v958_v43 }
  0x32   :  { %963 = vmatprep.subr.bf16.mxu1 %v962_v11 }
  0x35   :  { %965 = vmatpush3.bf16.msra.mxu1 %v962_v11 }
  0x83   :  { %v109_v44 = vpop.permute.xlu1 %108  ;;  %v99_v45 = vpop.permute.xlu0 %98 }
  0x84   :  { %v138_v52 = vmul.f32 %v109_v44, %v57_v46  ;;  %v136_v53 = vmul.f32 %v99_v45, %v55_v47  ;;  %v353_v44 = vld [vmem:[%s1433_s12] sm:$0xff]  ;;  %v354_v45 = vld [vmem:[%s1433_s12 + $0x8] sm:$0xff] }
  0x87   :  { %v114_v50 = vpop.permute.xlu1 %113  ;;  %v104_v51 = vpop.permute.xlu0 %103 }
  0x88   :  { %v139_v54 = vmul.f32 %v114_v50, %v58_v48  ;;  %v137_v55 = vmul.f32 %v104_v51, %v56_v49  ;;  %v966_v49 = vpack.c.bf16 %v354_v45, %v353_v44  ;;  %v355_v51 = vld [vmem:[%s1433_s12 + $0x10] sm:$0xff] }
  0x8a   :  { %v144_v58 = vpack.c.bf16 %v137_v55, %v136_v53  ;;  %v145_v61 = vpack.c.bf16 %v139_v54, %v138_v52  ;;  %v356_v52 = vld [vmem:[%s1433_s12 + $0x18] sm:$0xff]  ;;  %v1031_v53 = vld [vmem:[%s1424_s3] sm:$0xff]  }
  0x8b   :  { %v124_v59 = vpop.permute.xlu1 %123  ;;  %v119_v60 = vpop.permute.xlu0 %118  ;;  %v970_v54 = vpack.c.bf16 %v356_v52, %v355_v51  ;;  %v357_v55 = vld [vmem:[%s1433_s12 + $0x20] sm:$0xff] }
  0x8c   :  { %v141_v62 = vmul.f32 %v124_v59, %v60_v56  ;;  %v140_v63 = vmul.f32 %v119_v60, %v59_v57  ;;  %800 = vmatprep.subr.bf16.mxu0 %v144_v58  ;;  %v358_v56 = vld [vmem:[%s1433_s12 + $0x28] sm:$0xff]  ;;  %v360_v59 = vld [vmem:[%s1433_s12 + $0x38] sm:$0xff] }
  0x8d   :  { %801 = vmatpush3.bf16.msra.mxu0 %v144_v58  ;;  %v974_v57 = vpack.c.bf16 %v358_v56, %v357_v55  ;;  %v359_v58 = vld [vmem:[%s1433_s12 + $0x30] sm:$0xff] }
  0x8e   :  { %802 = vmatprep.subr.bf16.mxu0 %v145_v61  ;;  %v146_v4 = vpack.c.bf16 %v141_v62, %v140_v63  ;;  %v978_v60 = vpack.c.bf16 %v360_v59, %v359_v58  ;;  %v362_v62 = vld [vmem:[%s1433_s12 + $0x48] sm:$0xff] }
  0x8f   :  { %v134_v2 = vpop.permute.xlu1 %133  ;;  %v129_v3 = vpop.permute.xlu0 %128 }
  0x90   :  { %v143_v5 = vmul.f32 %v134_v2, %v62_v0  ;;  %v142_v6 = vmul.f32 %v129_v3, %v61_v1  ;;  %v363_v0 = vld [vmem:[%s1433_s12 + $0x50] sm:$0xff]  ;;  %v364_v1 = vld [vmem:[%s1433_s12 + $0x58] sm:$0xff]  ;;  %v365_v3 = vld [vmem:[%s1433_s12 + $0x60] sm:$0xff] }
  0x91   :  { %803 = vmatpush3.bf16.msra.mxu0 %v145_v61  ;;  %v361_v61 = vld [vmem:[%s1433_s12 + $0x40] sm:$0xff]  ;;  %v986_v2 = vpack.c.bf16 %v364_v1, %v363_v0 }
  0x92   :  { %804 = vmatprep.subr.bf16.mxu0 %v146_v4  ;;  %v147_v7 = vpack.c.bf16 %v143_v5, %v142_v6  ;;  %v982_v63 = vpack.c.bf16 %v362_v62, %v361_v61  ;;  %v367_v6 = vld [vmem:[%s1433_s12 + $0x70] sm:$0xff] }
  0x93   :  { %v307_v17 = vpop.permute.xlu1 %306  ;;  %v302_v18 = vpop.permute.xlu0 %301 }
  0x95   :  { %805 = vmatpush3.bf16.msra.mxu0 %v146_v4  ;;  %v366_v4 = vld [vmem:[%s1433_s12 + $0x68] sm:$0xff] }
  0x96   :  { %806 = vmatprep.subr.bf16.mxu0 %v147_v7  ;;  %v990_v5 = vpack.c.bf16 %v366_v4, %v365_v3 }
  0x97   :  { %v317_v19 = vpop.permute.xlu1 %316  ;;  %v312_v20 = vpop.permute.xlu0 %311 }
  0x99   :  { %807 = vmatpush3.bf16.msra.mxu0 %v147_v7  ;;  %v368_v7 = vld [vmem:[%s1433_s12 + $0x78] sm:$0xff] }
  0x9a   :  { %850 = vmatprep.subr.bf16.mxu0 %v1057_v16 }
  0x9b   :  { %v378_v27 = vpop.permute.xlu1 %377  ;;  %v373_v30 = vpop.permute.xlu0 %372 }
  0x9c   :  { %809 = vmatmul.mubr.msk.bf16.vlgmr.msra.gmra.mrb[0].mxu0 %vm158_vm0, %v1030_v8  ;;  %v994_v8 = vpack.c.bf16 %v368_v7, %v367_v6 }
  0x9d   :  { %854 = vmatprep.mubr.msk.bf16.mxu0 %vm1058_vm1, %v1057_v16 }
  0x9f   :  { %v388_v41 = vpop.permute.xlu1 %387  ;;  %v383_v46 = vpop.permute.xlu0 %382 }
 0x16f   :  { %v810_v12 = vpop.f32.mrb[0].mxu0 }
 0x170   :  { %v199_v13 = vpop.f32.mrb[1].mxu0 }
 0x171   :  { %v811_v14 = vpop.f32.mrb[2].mxu0  ;;  %844 = vmatprep.mubr.f32.mxu1 %v199_v13  ;;  %v551_v13 = vld [vmem:[%s1435_s14] sm:$0xff] }
 0x172   :  { %v202_v15 = vpop.f32.mrb[3].mxu0 }
 0x173   :  { %845 = vmatmul.mubr.f32.vlgmr.msra.gmra.mrb[0].mxu1 %v202_v15  ;;  %v553_v15 = vld [vmem:[%s1435_s14 + $0x10] sm:$0xff] }
 0x174   :  { %847 = vmatprep.mubr.f32.mxu1 %v810_v12 }
 0x177   :  { %848 = vmatmul.mubr.f32.gmra.mrb[2].mxu1 %v811_v14  ;;  %v552_v14 = vld [vmem:[%s1435_s14 + $0x8] sm:$0xff] }
 0x178   :  { %931 = vmatprep.mubr.msk.f32.mxu1 %vm1058_vm1, %v1057_v16 }
 0x246   :  { %v846_v22 = vpop.f32.mrb[0].mxu1 }
 0x247   :  { %v320_v23 = vmul.f32 %v846_v22, %v307_v17  ;;  %v280_v24 = vpop.f32.mrb[1].mxu1  ;;  %v1059_v17 = vmov 0.0|0.0  }
 0x248   :  { %v319_v25 = vmul.f32 %v302_v18, %v280_v24  ;;  %998 = vmatprep.subr.bf16.mxu1 %v1059_v17  ;;  %v999_v18 = vpack.c.bf16 %v552_v14, %v551_v13  ;;  %v558_v24 = vld [vmem:[%s1435_s14 + $0x38] sm:$0xff] }
 0x249   :  { %v330_v26 = vadd.f32 %v728_v21, %v320_v23  ;;  %v557_v23 = vld [vmem:[%s1435_s14 + $0x30] sm:$0xff] }
 0x24a   :  { %v329_v28 = vadd.f32 %v728_v21, %v319_v25  ;;  %v849_v29 = vpop.f32.mrb[2].mxu1  ;;  %1000 = vmatpush3.bf16.msra.mxu1 %v999_v18  ;;  %v1008_v25 = vpack.c.bf16 %v558_v24, %v557_v23 }
 0x24b   :  { %v334_v31 = vmax.f32 %v330_v26, 0.0  ;;  %v322_v32 = vmul.f32 %v849_v29, %v317_v19  ;;  %v290_v33 = vpop.f32.mrb[3].mxu1  ;;  %v554_v19 = vld [vmem:[%s1435_s14 + $0x18] sm:$0xff]  ;;  %1001 = vmatprep.subr.bf16.mxu1 %v1059_v17  ;;  %v559_v26 = vld [vmem:[%s1435_s14 + $0x40] sm:$0xff]  ;;  %v561_v29 = vld [vmem:[%s1435_s14 + $0x50] sm:$0xff] }
 0x24c   :  { %v333_v34 = vmax.f32 %v329_v28, 0.0  ;;  %v321_v35 = vmul.f32 %v312_v20, %v290_v33  ;;  %v555_v20 = vld [vmem:[%s1435_s14 + $0x20] sm:$0xff]  ;;  %v564_v33 = vld [vmem:[%s1435_s14 + $0x68] sm:$0xff] }
 0x24d   :  { %v391_v36 = vmul.f32 %v378_v27, %v334_v31  ;;  %v332_v37 = vadd.f32 %v728_v21, %v322_v32  ;;  %v560_v27 = vld [vmem:[%s1435_s14 + $0x48] sm:$0xff]  ;;  %v563_v32 = vld [vmem:[%s1435_s14 + $0x60] sm:$0xff] }
 0x24e   :  { %v390_v38 = vmul.f32 %v373_v30, %v333_v34  ;;  %v331_v39 = vadd.f32 %v728_v21, %v321_v35  ;;  %v556_v21 = vld [vmem:[%s1435_s14 + $0x28] sm:$0xff]  ;;  %v1011_v28 = vpack.c.bf16 %v560_v27, %v559_v26  ;;  %v562_v30 = vld [vmem:[%s1435_s14 + $0x58] sm:$0xff]  ;;  %v1017_v34 = vpack.c.bf16 %v564_v33, %v563_v32  ;;  %v565_v35 = vld [vmem:[%s1435_s14 + $0x70] sm:$0xff] }
 0x24f   :  { %v336_v40 = vmax.f32 %v332_v37, 0.0  ;;  %v1005_v22 = vpack.c.bf16 %v556_v21, %v555_v20  ;;  %v1014_v31 = vpack.c.bf16 %v562_v30, %v561_v29 }
 0x250   :  { %v394_v42 = vpack.c.bf16 %v391_v36, %v390_v38  ;;  %v335_v43 = vmax.f32 %v331_v39, 0.0  ;;  %v566_v36 = vld [vmem:[%s1435_s14 + $0x78] sm:$0xff]  ;;  %v529_v38 = vpop.permute.xlu1 %528  ;;  %v731_v39 = vld [vmem:[%s1434_s13] ss:$0 sm:$0xff] }
 0x251   :  { %v393_v47 = vmul.f32 %v388_v41, %v336_v40  ;;  %v1020_v37 = vpack.c.bf16 %v566_v36, %v565_v35  ;;  %v524_v41 = vpop.permute.xlu0 %523 }
 0x252   :  { %v392_v48 = vmul.f32 %v383_v46, %v335_v43  ;;  %851 = vmatpush3.bf16.msra.mxu0 %v394_v42 }
 0x253   :  { %852 = vmatprep.subr.bf16.mxu0 %v1057_v16 }
 0x254   :  { %v395_v50 = vpack.c.bf16 %v393_v47, %v392_v48  ;;  %v576_v48 = vpop.permute.xlu1 %575 }
 0x256   :  { %853 = vmatpush3.bf16.msra.mxu0 %v395_v50  ;;  %v571_v50 = vpop.permute.xlu0 %570 }
 0x257   :  { %967 = vmatprep.subr.bf16.mxu0 %v966_v49 }
 0x259   :  { %855 = vmatmul.mubr.msk.bf16.vlgmr.msra.gmra.mrb[4].mxu0 %vm401_vm2, %v1031_v53 }
 0x25a   :  { %969 = vmatpush3.bf16.msra.mxu0 %v966_v49  ;;  %v698_v59 = vpop.permute.xlu0 %697 }
 0x25b   :  { %971 = vmatprep.subr.bf16.mxu0 %v970_v54 }
 0x25e   :  { %973 = vmatpush3.bf16.msra.mxu0 %v970_v54  ;;  %v547_v54 = vld [vmem:[%s1427_s6] sm:$0xf]  ;;  %s1032_s6 = scalar_lea.vmem %s717_s7, 128 }
 0x25f   :  { %975 = vmatprep.subr.bf16.mxu0 %v974_v57  ;;  %p1033_p0 = scmp.ne.s32.totalorder %s717_s7, %s1032_s6  ;;  %p1038_p2 = scmp.lt.s32.totalorder %s1032_s6, %s1032_s6 }
 0x261   :  { %p1039_p3 = por %p1038_p2, %p1037_p1 }
 0x262   :  { %977 = vmatpush3.bf16.msra.mxu0 %v974_v57 }
 0x263   :  { %979 = vmatprep.subr.bf16.mxu0 %v978_v60  ;;  %p1040_p4 = pnand %p1039_p3, %p1033_p0 }
 0x266   :  { %981 = vmatpush3.bf16.msra.mxu0 %v978_v60  ;;  %v733_v60 = vld [vmem:[%s1436_s15] ss:$0 sm:$0xff] }
 0x267   :  { %983 = vmatprep.subr.bf16.mxu0 %v982_v63 }
 0x26a   :  { %985 = vmatpush3.bf16.msra.mxu0 %v982_v63 }
 0x26b   :  { %987 = vmatprep.subr.bf16.mxu0 %v986_v2 }
 0x26e   :  { %989 = vmatpush3.bf16.msra.mxu0 %v986_v2 }
 0x26f   :  { %991 = vmatprep.subr.bf16.mxu0 %v990_v5 }
 0x272   :  { %993 = vmatpush3.bf16.msra.mxu0 %v990_v5 }
 0x273   :  { %995 = vmatprep.subr.bf16.mxu0 %v994_v8 }
 0x276   :  { %997 = vmatpush3.bf16.msra.mxu0 %v994_v8 }
 0x277   :  { %893 = vmatprep.subr.bf16.mxu0 %v1057_v16 }
 0x32c   :  { %v439_v9 = vpop.f32.mrb[4].mxu0 }
 0x32d   :  { %v856_v10 = vpop.f32.mrb[5].mxu0  ;;  %890 = vmatprep.mubr.f32.mxu0 %v439_v9 }
 0x32e   :  { %v442_v11 = vpop.f32.mrb[6].mxu0 }
 0x32f   :  { %v857_v12 = vpop.f32.mrb[7].mxu0  ;;  %891 = vmatmul.mubr.f32.vlgmr.msra.gmra.mrb[8].mxu0 %v442_v11 }
 0x330   :  { %895 = vmatprep.mubr.msk.bf16.mxu0 %vm1058_vm1, %v1057_v16  ;;  %v1002_v16 = vpack.c.bf16 %v554_v19, %v553_v15 }
 0x332   :  { %1003 = vmatpush3.bf16.msra.mxu1 %v1002_v16 }
 0x333   :  { %1004 = vmatprep.subr.bf16.mxu1 %v1059_v17 }
 0x336   :  { %1006 = vmatpush3.bf16.msra.mxu1 %v1005_v22 }
 0x337   :  { %1007 = vmatprep.subr.bf16.mxu1 %v1059_v17 }
 0x33a   :  { %1009 = vmatpush3.bf16.msra.mxu1 %v1008_v25 }
 0x33b   :  { %1010 = vmatprep.subr.bf16.mxu1 %v1059_v17 }
 0x33e   :  { %1012 = vmatpush3.bf16.msra.mxu1 %v1011_v28 }
 0x33f   :  { %1013 = vmatprep.subr.bf16.mxu1 %v1059_v17 }
 0x342   :  { %1015 = vmatpush3.bf16.msra.mxu1 %v1014_v31 }
 0x343   :  { %1016 = vmatprep.subr.bf16.mxu1 %v1059_v17 }
 0x346   :  { %1018 = vmatpush3.bf16.msra.mxu1 %v1017_v34 }
 0x347   :  { %1019 = vmatprep.subr.bf16.mxu1 %v1059_v17 }
 0x34a   :  { %1021 = vmatpush3.bf16.msra.mxu1 %v1020_v37 }
 0x402   :  { %v892_v40 = vpop.f32.mrb[8].mxu0 }
 0x403   :  { %v532_v42 = vmul.f32 %v892_v40, %v529_v38  ;;  %v512_v43 = vpop.f32.mrb[9].mxu0 }
 0x404   :  { %v531_v44 = vmul.f32 %v524_v41, %v512_v43 }
 0x405   :  { %v540_v45 = vadd.f32 %v731_v39, %v532_v42 }
 0x406   :  { %v539_v46 = vadd.f32 %v731_v39, %v531_v44 }
 0x407   :  { %v542_v47 = vmax.f32 %v540_v45, 0.0 }
 0x408   :  { %v541_v49 = vmax.f32 %v539_v46, 0.0 }
 0x409   :  { %v579_v51 = vmul.f32 %v576_v48, %v542_v47 }
 0x40a   :  { %v578_v52 = vmul.f32 %v571_v50, %v541_v49 }
 0x40c   :  { %v580_v53 = vpack.c.bf16 %v579_v51, %v578_v52 }
 0x40e   :  { %894 = vmatpush3.bf16.msra.mxu0 %v580_v53 }
 0x411   :  { %896 = vmatmul.mubr.msk.bf16.vlgmr.msra.gmra.mrb[12].mxu0 %vm581_vm3, %v547_v54 }
 0x4e4   :  { %v619_v55 = vpop.f32.mrb[12].mxu0 }
 0x4e5   :  { %v897_v56 = vpop.f32.mrb[13].mxu0  ;;  %932 = vmatmul.mubr.f32.vlgmr.msra.gmra.mrb[4].mxu1 %v619_v55 }
 0x4e6   :  { %v622_v57 = vpop.f32.mrb[14].mxu0 }
 0x4e7   :  { %v898_v58 = vpop.f32.mrb[15].mxu0 }
 0x5b8   :  { %v691_v61 = vpop.f32.mrb[4].mxu1 }
 0x5b9   :  { %v700_v62 = vmul.f32 %v698_v59, %v691_v61  ;;  %v933_v63 = vpop.f32.mrb[5].mxu1 }
 0x5bb   :  { %v707_v0 = vadd.f32 %v733_v60, %v700_v62 }
 0x5bd   :  { %v708_v1 = vmax.f32 %v707_v0, 0.0 }
 0x5bf   :  { %709 = vst [vmem:[#allocation4] sm:$0xff] %v708_v1 }
 0x5c0   :  { %1043 = shalt.err (!%p1040_p4)
}
 0x5c1   :  { %s1044_s15 = scalar_lea.hbm %s1437_s16, 128 }
 0x5c2   :  { %p1045_p5 = scmp.ne.s32.totalorder %s1437_s16, %s1044_s15  ;;  %p1048_p6 = scmp.lt.u32.totalorder %s1044_s15, %s1437_s16 }
 0x5c4   :  { %p1050_p7 = pnand %p1048_p6, %p1045_p5 }
 0x5c6   :  { %1053 = shalt.err (!%p1050_p7)
}
 0x5c7   :  { %719 = dma.vmem_to_hbm [thread:$0]  %s717_s7, 128, %s1437_s16, [#allocation5]  }
 0x5c8   :  { %1054 = dma.done.wait [#allocation5], 128  }
 0x5c9   :  { %1055 = vsyncadd [#allocation5], 4294967168 }
 0x5ca   :  { %723 = vsyncpa [#allocation5], 1 }

</bundles_post_ra>
